<compile_context>
chip_gen: v7x
topology: tpu7x:2x2x1
jax: 0.10.0
libtpu: 0.0.40
codegen_flags: <defaults>
</compile_context>

<pallas_src>
import jax
import jax.numpy as jnp
from jax.experimental import pallas as pl
from jax.experimental.pallas import tpu as pltpu

H = W = 11      # YINSH board is 11x11
EPS = 1e-5


def _make_attention_block_kernel(c, h, w, p):
    hp, wp = h + 2, w + 2                 # zero-padded board dims (13x13)
    npix = hp * wp                        # 169 padded pixels, flattened on lanes
    assert p % 128 == 0 and p >= npix
    # flat lane offset of tap (ky, kx); tap index t = ky*3 + kx, |off| <= wp+1
    taps = [(ky - 1) * wp + (kx - 1) for ky in range(3) for kx in range(3)]

    def kernel(x_ref, w3_ref, attp_ref, vecs_ref, o_ref):
        f32 = jnp.float32
        x = x_ref[...]                                   # (c, p); zero outside interior

        # Interior-position mask along lanes (pad ring and lane tail -> 0),
        # built from iota + per-row range tests (no integer div/mod needed).
        q = jax.lax.broadcasted_iota(jnp.int32, (1, p), 1)
        interior = jnp.zeros((1, p), f32)
        for r in range(1, hp - 1):
            lo = r * wp + 1
            interior = interior + ((q >= lo) & (q < lo + w)).astype(f32)

        # ---- SpatialAttention: two 1x1 convs over the channel (sublane) axis ----
        wa1 = attp_ref[:, 0:c]                           # (c, c); rows >= c//2 are zero
        ba1 = attp_ref[:, c:c + 1]                       # (c, 1)
        wa2 = attp_ref[:, c + 1:c + 2]                   # (c, 1); rows >= c//2 are zero
        ba2 = attp_ref[0:1, c + 2:c + 3]                 # (1, 1)
        a = jnp.maximum(jnp.dot(wa1, x, preferred_element_type=f32) + ba1, 0.0)
        z = jnp.sum(a * wa2, axis=0, keepdims=True) + ba2          # (1, p)
        att = 0.5 * jnp.tanh(0.5 * z) + 0.5              # sigmoid via EUP tanh
        # (att is only consumed at interior positions; pad-lane values are
        #  multiplied by zeros or sliced away by the wrapper.)

        s1 = vecs_ref[:, 0:1]                            # folded bn1 scale   (c, 1)
        t1 = vecs_ref[:, 1:2]                            # folded bn1 shift + conv1 bias
        s2 = vecs_ref[:, 2:3]
        t2 = vecs_ref[:, 3:4]

        def conv3x3(inp, widx):
            # `inp` must be zero at every non-interior lane so the circular
            # rolls implement SAME zero padding (interior taps never wrap).
            acc = jnp.zeros((c, p), f32)
            for t, off in enumerate(taps):
                shifted = inp if off == 0 else pltpu.roll(inp, (-off) % p, axis=1)
                acc = acc + jnp.dot(w3_ref[widx, t], shifted,
                                    preferred_element_type=f32)
            return acc

        # conv1 -> bn1 (folded) -> relu, then re-zero the pad ring for conv2
        h1 = jnp.maximum(conv3x3(x * att, 0) * s1 + t1, 0.0) * interior
        # conv2 -> bn2 (folded)
        h2 = conv3x3(h1, 1) * s2 + t2
        # attention gate + residual + relu (non-interior lanes hold junk by
        # design; the wrapper slices them away)
        o_ref[...] = jnp.maximum(h2 * att + x, 0.0)

    return kernel


def _pack_params(params, c):
    """Fold BN + conv biases and pack everything into three small arrays."""
    c2 = c // 2
    s1 = params['g1'] / jnp.sqrt(params['v1'] + EPS)
    t1 = params['b1'] - params['m1'] * s1 + params['bc1'] * s1   # conv1 bias folded in
    s2 = params['g2'] / jnp.sqrt(params['v2'] + EPS)
    t2 = params['b2'] - params['m2'] * s2 + params['bc2'] * s2
    vecs = jnp.stack([s1, t1, s2, t2], axis=1).astype(jnp.float32)      # (c, 4)

    def tapped(w_oihw):   # PyTorch OIHW -> (tap=ky*3+kx, C_out, C_in)
        return jnp.transpose(w_oihw, (2, 3, 0, 1)).reshape(9, c, c)
    w3 = jnp.stack([tapped(params['wc1']),
                    tapped(params['wc2'])]).astype(jnp.float32)          # (2, 9, c, c)

    # attention params packed into one (c, c+3) array (unused rows stay zero)
    attp = jnp.zeros((c, c + 3), jnp.float32)
    attp = attp.at[:c2, :c].set(params['wa1'])          # 1x1 conv1 weight (out, in)
    attp = attp.at[:c2, c].set(params['ba1'])           # 1x1 conv1 bias
    attp = attp.at[:c2, c + 1].set(params['wa2'][0])    # 1x1 conv2 weight (as a column)
    attp = attp.at[0, c + 2].set(params['ba2'][0])      # 1x1 conv2 bias (scalar)
    return w3, attp, vecs


def attention_block_forward(x_nchw, params):
    b, c, h, w = x_nchw.shape
    hp, wp = h + 2, w + 2
    npix = hp * wp
    p = pl.cdiv(npix, 128) * 128                 # lane-padded spatial extent (169 -> 256)

    # NCHW already has spatial last: just zero-pad the ring, flatten, lane-pad.
    xp = jnp.pad(x_nchw.astype(jnp.float32), ((0, 0), (0, 0), (1, 1), (1, 1)))
    xp = jnp.pad(xp.reshape(b, c, npix), ((0, 0), (0, 0), (0, p - npix)))   # (b, c, p)

    w3, attp, vecs = _pack_params(params, c)

    def const_spec(arr):
        nd = arr.ndim
        return pl.BlockSpec(arr.shape, lambda i, nd=nd: (0,) * nd)

    out = pl.pallas_call(
        _make_attention_block_kernel(c, h, w, p),
        out_shape=jax.ShapeDtypeStruct((b, c, p), jnp.float32),
        grid=(b,),                               # one image per step; both TCs on v7x
        in_specs=[pl.BlockSpec((None, c, p), lambda i: (i, 0, 0)),
                  const_spec(w3), const_spec(attp), const_spec(vecs)],
        out_specs=pl.BlockSpec((None, c, p), lambda i: (i, 0, 0)),
        compiler_params=pltpu.CompilerParams(dimension_semantics=("parallel",)),
    )(xp, w3, attp, vecs)

    # Drop the lane padding and the spatial pad ring; layout is already NCHW.
    out = out[:, :, :npix].reshape(b, c, hp, wp)[:, :, 1:h + 1, 1:w + 1]
    return out


def init_params(key, c):
    """Deterministic synthetic parameters; shapes mirror the PyTorch module."""
    c2 = c // 2
    ks = jax.random.split(key, 16)
    nrm = lambda k, shape, s=0.1: (s * jax.random.normal(k, shape)).astype(jnp.float32)
    return {
        # SpatialAttention: Conv2d(c, c//2, 1) and Conv2d(c//2, 1, 1)
        'wa1': nrm(ks[0], (c2, c)), 'ba1': nrm(ks[1], (c2,)),
        'wa2': nrm(ks[2], (1, c2)), 'ba2': nrm(ks[3], (1,)),
        # Conv2d(c, c, 3, padding=1) weights in PyTorch OIHW layout
        'wc1': nrm(ks[4], (c, c, 3, 3)), 'bc1': nrm(ks[5], (c,)),
        'wc2': nrm(ks[6], (c, c, 3, 3)), 'bc2': nrm(ks[7], (c,)),
        # BatchNorm2d (eval mode) running stats / affine params
        'g1': (1.0 + 0.1 * jax.random.normal(ks[8], (c,))).astype(jnp.float32),
        'b1': nrm(ks[9], (c,)),
        'm1': nrm(ks[10], (c,)),
        'v1': jax.random.uniform(ks[11], (c,), minval=0.5, maxval=1.5).astype(jnp.float32),
        'g2': (1.0 + 0.1 * jax.random.normal(ks[12], (c,))).astype(jnp.float32),
        'b2': nrm(ks[13], (c,)),
        'm2': nrm(ks[14], (c,)),
        'v2': jax.random.uniform(ks[15], (c,), minval=0.5, maxval=1.5).astype(jnp.float32),
    }


def ref_forward(x_nchw, pdict):
    """Pure-JAX NCHW reference (lax conv) for numerical verification."""
    x = x_nchw.astype(jnp.float32)
    a = jnp.maximum(jnp.einsum('oc,bchw->bohw', pdict['wa1'], x)
                    + pdict['ba1'][None, :, None, None], 0.0)
    z = jnp.einsum('oc,bchw->bohw', pdict['wa2'], a) + pdict['ba2'][None, :, None, None]
    att = jax.nn.sigmoid(z)                                   # (b, 1, h, w)

    def conv3(inp, wk, bias):
        y = jax.lax.conv_general_dilated(
            inp, wk, window_strides=(1, 1), padding='SAME',
            dimension_numbers=('NCHW', 'OIHW', 'NCHW'))
        return y + bias[None, :, None, None]

    def bn(u, g, beta, m, v):
        s = g / jnp.sqrt(v + EPS)
        return u * s[None, :, None, None] + (beta - m * s)[None, :, None, None]

    out = jnp.maximum(bn(conv3(x * att, pdict['wc1'], pdict['bc1']),
                         pdict['g1'], pdict['b1'], pdict['m1'], pdict['v1']), 0.0)
    out = bn(conv3(out, pdict['wc2'], pdict['bc2']),
             pdict['g2'], pdict['b2'], pdict['m2'], pdict['v2'])
    out = out * att
    return jnp.maximum(out + x, 0.0)


if __name__ == "__main__":
    B, C = 2, 8
    key = jax.random.PRNGKey(0)
    kx, kp = jax.random.split(key)
    x = jax.random.normal(kx, (B, C, H, W), dtype=jnp.float32)
    params = init_params(kp, C)

    out = attention_block_forward(x, params)
    out = jax.block_until_ready(out)

    ref = ref_forward(x, params)
    assert out.shape == (B, C, H, W), out.shape
    err = float(jnp.max(jnp.abs(out - ref)))
    if err > 2e-4:
        raise AssertionError(f"kernel/reference mismatch: max abs err = {err}")
    print("KERNEL_OK")
</pallas_src>

<mosaic_0001>
module attributes {stable_mosaic.version = 11 : i64} {
  func.func @kernel(%arg0: i32, %arg1: memref<1x8x256xf32, #tpu.memory_space<vmem>>, %arg2: memref<2x9x8x8xf32, #tpu.memory_space<vmem>>, %arg3: memref<8x11xf32, #tpu.memory_space<vmem>>, %arg4: memref<8x4xf32, #tpu.memory_space<vmem>>, %arg5: memref<1x8x256xf32, #tpu.memory_space<vmem>>) attributes {dimension_semantics = [#tpu.dimension_semantics<parallel>], iteration_bounds = array<i64: 2>, scalar_prefetch = 0 : i64, scratch_operands = 0 : i64, tpu.core_type = #tpu.core_type<tc>, window_params = [{transform_indices = @transform_0, window_bounds = array<i64: 1, 8, 256>}, {pipeline_mode = #tpu.pipeline_mode<synchronous>, transform_indices = @transform_1, window_bounds = array<i64: 2, 9, 8, 8>}, {pipeline_mode = #tpu.pipeline_mode<synchronous>, transform_indices = @transform_2, window_bounds = array<i64: 8, 11>}, {pipeline_mode = #tpu.pipeline_mode<synchronous>, transform_indices = @transform_3, window_bounds = array<i64: 8, 4>}, {transform_indices = @transform_4, window_bounds = array<i64: 1, 8, 256>}]} {
    %c0 = arith.constant 0 : index
    %c0_0 = arith.constant 0 : index
    %c0_1 = arith.constant 0 : index
    %0 = vector.load %arg1[%c0, %c0_0, %c0_1] : memref<1x8x256xf32, #tpu.memory_space<vmem>>, vector<1x8x256xf32>
    %1 = vector.shape_cast %0 : vector<1x8x256xf32> to vector<8x256xf32>
    %2 = tpu.iota {dimensions = array<i32: 1>} : vector<1x256xi32>
    %cst = arith.constant 0.000000e+00 : f32
    %3 = vector.broadcast %cst : f32 to vector<1x256xf32>
    %c14_i32 = arith.constant 14 : i32
    %4 = vector.broadcast %c14_i32 : i32 to vector<1x256xi32>
    %5 = arith.cmpi sge, %2, %4 : vector<1x256xi32>
    %c25_i32 = arith.constant 25 : i32
    %6 = vector.broadcast %c25_i32 : i32 to vector<1x256xi32>
    %7 = arith.cmpi slt, %2, %6 : vector<1x256xi32>
    %8 = arith.andi %5, %7 : vector<1x256xi1>
    %9 = arith.extui %8 : vector<1x256xi1> to vector<1x256xi32>
    %10 = arith.sitofp %9 : vector<1x256xi32> to vector<1x256xf32>
    %11 = arith.addf %3, %10 : vector<1x256xf32>
    %c27_i32 = arith.constant 27 : i32
    %12 = vector.broadcast %c27_i32 : i32 to vector<1x256xi32>
    %13 = arith.cmpi sge, %2, %12 : vector<1x256xi32>
    %c38_i32 = arith.constant 38 : i32
    %14 = vector.broadcast %c38_i32 : i32 to vector<1x256xi32>
    %15 = arith.cmpi slt, %2, %14 : vector<1x256xi32>
    %16 = arith.andi %13, %15 : vector<1x256xi1>
    %17 = arith.extui %16 : vector<1x256xi1> to vector<1x256xi32>
    %18 = arith.sitofp %17 : vector<1x256xi32> to vector<1x256xf32>
    %19 = arith.addf %11, %18 : vector<1x256xf32>
    %c40_i32 = arith.constant 40 : i32
    %20 = vector.broadcast %c40_i32 : i32 to vector<1x256xi32>
    %21 = arith.cmpi sge, %2, %20 : vector<1x256xi32>
    %c51_i32 = arith.constant 51 : i32
    %22 = vector.broadcast %c51_i32 : i32 to vector<1x256xi32>
    %23 = arith.cmpi slt, %2, %22 : vector<1x256xi32>
    %24 = arith.andi %21, %23 : vector<1x256xi1>
    %25 = arith.extui %24 : vector<1x256xi1> to vector<1x256xi32>
    %26 = arith.sitofp %25 : vector<1x256xi32> to vector<1x256xf32>
    %27 = arith.addf %19, %26 : vector<1x256xf32>
    %c53_i32 = arith.constant 53 : i32
    %28 = vector.broadcast %c53_i32 : i32 to vector<1x256xi32>
    %29 = arith.cmpi sge, %2, %28 : vector<1x256xi32>
    %c64_i32 = arith.constant 64 : i32
    %30 = vector.broadcast %c64_i32 : i32 to vector<1x256xi32>
    %31 = arith.cmpi slt, %2, %30 : vector<1x256xi32>
    %32 = arith.andi %29, %31 : vector<1x256xi1>
    %33 = arith.extui %32 : vector<1x256xi1> to vector<1x256xi32>
    %34 = arith.sitofp %33 : vector<1x256xi32> to vector<1x256xf32>
    %35 = arith.addf %27, %34 : vector<1x256xf32>
    %c66_i32 = arith.constant 66 : i32
    %36 = vector.broadcast %c66_i32 : i32 to vector<1x256xi32>
    %37 = arith.cmpi sge, %2, %36 : vector<1x256xi32>
    %c77_i32 = arith.constant 77 : i32
    %38 = vector.broadcast %c77_i32 : i32 to vector<1x256xi32>
    %39 = arith.cmpi slt, %2, %38 : vector<1x256xi32>
    %40 = arith.andi %37, %39 : vector<1x256xi1>
    %41 = arith.extui %40 : vector<1x256xi1> to vector<1x256xi32>
    %42 = arith.sitofp %41 : vector<1x256xi32> to vector<1x256xf32>
    %43 = arith.addf %35, %42 : vector<1x256xf32>
    %c79_i32 = arith.constant 79 : i32
    %44 = vector.broadcast %c79_i32 : i32 to vector<1x256xi32>
    %45 = arith.cmpi sge, %2, %44 : vector<1x256xi32>
    %c90_i32 = arith.constant 90 : i32
    %46 = vector.broadcast %c90_i32 : i32 to vector<1x256xi32>
    %47 = arith.cmpi slt, %2, %46 : vector<1x256xi32>
    %48 = arith.andi %45, %47 : vector<1x256xi1>
    %49 = arith.extui %48 : vector<1x256xi1> to vector<1x256xi32>
    %50 = arith.sitofp %49 : vector<1x256xi32> to vector<1x256xf32>
    %51 = arith.addf %43, %50 : vector<1x256xf32>
    %c92_i32 = arith.constant 92 : i32
    %52 = vector.broadcast %c92_i32 : i32 to vector<1x256xi32>
    %53 = arith.cmpi sge, %2, %52 : vector<1x256xi32>
    %c103_i32 = arith.constant 103 : i32
    %54 = vector.broadcast %c103_i32 : i32 to vector<1x256xi32>
    %55 = arith.cmpi slt, %2, %54 : vector<1x256xi32>
    %56 = arith.andi %53, %55 : vector<1x256xi1>
    %57 = arith.extui %56 : vector<1x256xi1> to vector<1x256xi32>
    %58 = arith.sitofp %57 : vector<1x256xi32> to vector<1x256xf32>
    %59 = arith.addf %51, %58 : vector<1x256xf32>
    %c105_i32 = arith.constant 105 : i32
    %60 = vector.broadcast %c105_i32 : i32 to vector<1x256xi32>
    %61 = arith.cmpi sge, %2, %60 : vector<1x256xi32>
    %c116_i32 = arith.constant 116 : i32
    %62 = vector.broadcast %c116_i32 : i32 to vector<1x256xi32>
    %63 = arith.cmpi slt, %2, %62 : vector<1x256xi32>
    %64 = arith.andi %61, %63 : vector<1x256xi1>
    %65 = arith.extui %64 : vector<1x256xi1> to vector<1x256xi32>
    %66 = arith.sitofp %65 : vector<1x256xi32> to vector<1x256xf32>
    %67 = arith.addf %59, %66 : vector<1x256xf32>
    %c118_i32 = arith.constant 118 : i32
    %68 = vector.broadcast %c118_i32 : i32 to vector<1x256xi32>
    %69 = arith.cmpi sge, %2, %68 : vector<1x256xi32>
    %c129_i32 = arith.constant 129 : i32
    %70 = vector.broadcast %c129_i32 : i32 to vector<1x256xi32>
    %71 = arith.cmpi slt, %2, %70 : vector<1x256xi32>
    %72 = arith.andi %69, %71 : vector<1x256xi1>
    %73 = arith.extui %72 : vector<1x256xi1> to vector<1x256xi32>
    %74 = arith.sitofp %73 : vector<1x256xi32> to vector<1x256xf32>
    %75 = arith.addf %67, %74 : vector<1x256xf32>
    %c131_i32 = arith.constant 131 : i32
    %76 = vector.broadcast %c131_i32 : i32 to vector<1x256xi32>
    %77 = arith.cmpi sge, %2, %76 : vector<1x256xi32>
    %c142_i32 = arith.constant 142 : i32
    %78 = vector.broadcast %c142_i32 : i32 to vector<1x256xi32>
    %79 = arith.cmpi slt, %2, %78 : vector<1x256xi32>
    %80 = arith.andi %77, %79 : vector<1x256xi1>
    %81 = arith.extui %80 : vector<1x256xi1> to vector<1x256xi32>
    %82 = arith.sitofp %81 : vector<1x256xi32> to vector<1x256xf32>
    %83 = arith.addf %75, %82 : vector<1x256xf32>
    %c144_i32 = arith.constant 144 : i32
    %84 = vector.broadcast %c144_i32 : i32 to vector<1x256xi32>
    %85 = arith.cmpi sge, %2, %84 : vector<1x256xi32>
    %c155_i32 = arith.constant 155 : i32
    %86 = vector.broadcast %c155_i32 : i32 to vector<1x256xi32>
    %87 = arith.cmpi slt, %2, %86 : vector<1x256xi32>
    %88 = arith.andi %85, %87 : vector<1x256xi1>
    %89 = arith.extui %88 : vector<1x256xi1> to vector<1x256xi32>
    %90 = arith.sitofp %89 : vector<1x256xi32> to vector<1x256xf32>
    %91 = arith.addf %83, %90 : vector<1x256xf32>
    %c0_2 = arith.constant 0 : index
    %c0_3 = arith.constant 0 : index
    %92 = vector.load %arg3[%c0_2, %c0_3] : memref<8x11xf32, #tpu.memory_space<vmem>>, vector<8x8xf32>
    %c0_4 = arith.constant 0 : index
    %c8 = arith.constant 8 : index
    %93 = vector.load %arg3[%c0_4, %c8] : memref<8x11xf32, #tpu.memory_space<vmem>>, vector<8x1xf32>
    %c0_5 = arith.constant 0 : index
    %c9 = arith.constant 9 : index
    %94 = vector.load %arg3[%c0_5, %c9] : memref<8x11xf32, #tpu.memory_space<vmem>>, vector<8x1xf32>
    %c0_6 = arith.constant 0 : index
    %c10 = arith.constant 10 : index
    %95 = vector.load %arg3[%c0_6, %c10] : memref<8x11xf32, #tpu.memory_space<vmem>>, vector<1x1xf32>
    %cst_7 = arith.constant dense<0.000000e+00> : vector<8x256xf32>
    %96 = tpu.matmul %92, %1, %cst_7 {dimension_numbers = #tpu.dot_dimension_numbers<[1], [0], [0], [1], [0, 0, 1, 1], [], []>} : vector<8x8xf32>, vector<8x256xf32>, vector<8x256xf32> -> vector<8x256xf32>
    %97 = vector.broadcast %93 : vector<8x1xf32> to vector<8x256xf32>
    %98 = arith.addf %96, %97 : vector<8x256xf32>
    %cst_8 = arith.constant 0.000000e+00 : f32
    %99 = vector.broadcast %cst_8 : f32 to vector<8x256xf32>
    %100 = arith.maximumf %98, %99 : vector<8x256xf32>
    %101 = vector.broadcast %94 : vector<8x1xf32> to vector<8x256xf32>
    %102 = arith.mulf %100, %101 : vector<8x256xf32>
    %cst_9 = arith.constant dense<0.000000e+00> : vector<256xf32>
    %103 = vector.multi_reduction <add>, %102, %cst_9 [0] : vector<8x256xf32> to vector<256xf32>
    %104 = vector.shape_cast %103 : vector<256xf32> to vector<1x256xf32>
    %105 = vector.broadcast %95 : vector<1x1xf32> to vector<1x256xf32>
    %106 = arith.addf %104, %105 : vector<1x256xf32>
    %cst_10 = arith.constant 5.000000e-01 : f32
    %107 = vector.broadcast %cst_10 : f32 to vector<1x256xf32>
    %108 = arith.mulf %107, %106 : vector<1x256xf32>
    %109 = math.tanh %108 : vector<1x256xf32>
    %cst_11 = arith.constant 5.000000e-01 : f32
    %110 = vector.broadcast %cst_11 : f32 to vector<1x256xf32>
    %111 = arith.mulf %110, %109 : vector<1x256xf32>
    %cst_12 = arith.constant 5.000000e-01 : f32
    %112 = vector.broadcast %cst_12 : f32 to vector<1x256xf32>
    %113 = arith.addf %111, %112 : vector<1x256xf32>
    %c0_13 = arith.constant 0 : index
    %c0_14 = arith.constant 0 : index
    %114 = vector.load %arg4[%c0_13, %c0_14] : memref<8x4xf32, #tpu.memory_space<vmem>>, vector<8x1xf32>
    %c0_15 = arith.constant 0 : index
    %c1 = arith.constant 1 : index
    %115 = vector.load %arg4[%c0_15, %c1] : memref<8x4xf32, #tpu.memory_space<vmem>>, vector<8x1xf32>
    %c0_16 = arith.constant 0 : index
    %c2 = arith.constant 2 : index
    %116 = vector.load %arg4[%c0_16, %c2] : memref<8x4xf32, #tpu.memory_space<vmem>>, vector<8x1xf32>
    %c0_17 = arith.constant 0 : index
    %c3 = arith.constant 3 : index
    %117 = vector.load %arg4[%c0_17, %c3] : memref<8x4xf32, #tpu.memory_space<vmem>>, vector<8x1xf32>
    %118 = vector.broadcast %113 : vector<1x256xf32> to vector<8x256xf32>
    %119 = arith.mulf %1, %118 : vector<8x256xf32>
    %cst_18 = arith.constant 0.000000e+00 : f32
    %120 = vector.broadcast %cst_18 : f32 to vector<8x256xf32>
    %c14_i32_19 = arith.constant 14 : i32
    %121 = tpu.dynamic_rotate %119 by %c14_i32_19 dim 1 : vector<8x256xf32>, i32 -> vector<8x256xf32>
    %c0_20 = arith.constant 0 : index
    %c0_21 = arith.constant 0 : index
    %c0_22 = arith.constant 0 : index
    %c0_23 = arith.constant 0 : index
    %122 = vector.load %arg2[%c0_20, %c0_21, %c0_22, %c0_23] : memref<2x9x8x8xf32, #tpu.memory_space<vmem>>, vector<1x1x8x8xf32>
    %123 = vector.shape_cast %122 : vector<1x1x8x8xf32> to vector<8x8xf32>
    %cst_24 = arith.constant dense<0.000000e+00> : vector<8x256xf32>
    %124 = tpu.matmul %123, %121, %cst_24 {dimension_numbers = #tpu.dot_dimension_numbers<[1], [0], [0], [1], [0, 0, 1, 1], [], []>} : vector<8x8xf32>, vector<8x256xf32>, vector<8x256xf32> -> vector<8x256xf32>
    %125 = arith.addf %120, %124 : vector<8x256xf32>
    %c13_i32 = arith.constant 13 : i32
    %126 = tpu.dynamic_rotate %119 by %c13_i32 dim 1 : vector<8x256xf32>, i32 -> vector<8x256xf32>
    %c0_25 = arith.constant 0 : index
    %c1_26 = arith.constant 1 : index
    %c0_27 = arith.constant 0 : index
    %c0_28 = arith.constant 0 : index
    %127 = vector.load %arg2[%c0_25, %c1_26, %c0_27, %c0_28] : memref<2x9x8x8xf32, #tpu.memory_space<vmem>>, vector<1x1x8x8xf32>
    %128 = vector.shape_cast %127 : vector<1x1x8x8xf32> to vector<8x8xf32>
    %cst_29 = arith.constant dense<0.000000e+00> : vector<8x256xf32>
    %129 = tpu.matmul %128, %126, %cst_29 {dimension_numbers = #tpu.dot_dimension_numbers<[1], [0], [0], [1], [0, 0, 1, 1], [], []>} : vector<8x8xf32>, vector<8x256xf32>, vector<8x256xf32> -> vector<8x256xf32>
    %130 = arith.addf %125, %129 : vector<8x256xf32>
    %c12_i32 = arith.constant 12 : i32
    %131 = tpu.dynamic_rotate %119 by %c12_i32 dim 1 : vector<8x256xf32>, i32 -> vector<8x256xf32>
    %c0_30 = arith.constant 0 : index
    %c2_31 = arith.constant 2 : index
    %c0_32 = arith.constant 0 : index
    %c0_33 = arith.constant 0 : index
    %132 = vector.load %arg2[%c0_30, %c2_31, %c0_32, %c0_33] : memref<2x9x8x8xf32, #tpu.memory_space<vmem>>, vector<1x1x8x8xf32>
    %133 = vector.shape_cast %132 : vector<1x1x8x8xf32> to vector<8x8xf32>
    %cst_34 = arith.constant dense<0.000000e+00> : vector<8x256xf32>
    %134 = tpu.matmul %133, %131, %cst_34 {dimension_numbers = #tpu.dot_dimension_numbers<[1], [0], [0], [1], [0, 0, 1, 1], [], []>} : vector<8x8xf32>, vector<8x256xf32>, vector<8x256xf32> -> vector<8x256xf32>
    %135 = arith.addf %130, %134 : vector<8x256xf32>
    %c1_i32 = arith.constant 1 : i32
    %136 = tpu.dynamic_rotate %119 by %c1_i32 dim 1 : vector<8x256xf32>, i32 -> vector<8x256xf32>
    %c0_35 = arith.constant 0 : index
    %c3_36 = arith.constant 3 : index
    %c0_37 = arith.constant 0 : index
    %c0_38 = arith.constant 0 : index
    %137 = vector.load %arg2[%c0_35, %c3_36, %c0_37, %c0_38] : memref<2x9x8x8xf32, #tpu.memory_space<vmem>>, vector<1x1x8x8xf32>
    %138 = vector.shape_cast %137 : vector<1x1x8x8xf32> to vector<8x8xf32>
    %cst_39 = arith.constant dense<0.000000e+00> : vector<8x256xf32>
    %139 = tpu.matmul %138, %136, %cst_39 {dimension_numbers = #tpu.dot_dimension_numbers<[1], [0], [0], [1], [0, 0, 1, 1], [], []>} : vector<8x8xf32>, vector<8x256xf32>, vector<8x256xf32> -> vector<8x256xf32>
    %140 = arith.addf %135, %139 : vector<8x256xf32>
    %c0_40 = arith.constant 0 : index
    %c4 = arith.constant 4 : index
    %c0_41 = arith.constant 0 : index
    %c0_42 = arith.constant 0 : index
    %141 = vector.load %arg2[%c0_40, %c4, %c0_41, %c0_42] : memref<2x9x8x8xf32, #tpu.memory_space<vmem>>, vector<1x1x8x8xf32>
    %142 = vector.shape_cast %141 : vector<1x1x8x8xf32> to vector<8x8xf32>
    %cst_43 = arith.constant dense<0.000000e+00> : vector<8x256xf32>
    %143 = tpu.matmul %142, %119, %cst_43 {dimension_numbers = #tpu.dot_dimension_numbers<[1], [0], [0], [1], [0, 0, 1, 1], [], []>} : vector<8x8xf32>, vector<8x256xf32>, vector<8x256xf32> -> vector<8x256xf32>
    %144 = arith.addf %140, %143 : vector<8x256xf32>
    %c255_i32 = arith.constant 255 : i32
    %145 = tpu.dynamic_rotate %119 by %c255_i32 dim 1 : vector<8x256xf32>, i32 -> vector<8x256xf32>
    %c0_44 = arith.constant 0 : index
    %c5 = arith.constant 5 : index
    %c0_45 = arith.constant 0 : index
    %c0_46 = arith.constant 0 : index
    %146 = vector.load %arg2[%c0_44, %c5, %c0_45, %c0_46] : memref<2x9x8x8xf32, #tpu.memory_space<vmem>>, vector<1x1x8x8xf32>
    %147 = vector.shape_cast %146 : vector<1x1x8x8xf32> to vector<8x8xf32>
    %cst_47 = arith.constant dense<0.000000e+00> : vector<8x256xf32>
    %148 = tpu.matmul %147, %145, %cst_47 {dimension_numbers = #tpu.dot_dimension_numbers<[1], [0], [0], [1], [0, 0, 1, 1], [], []>} : vector<8x8xf32>, vector<8x256xf32>, vector<8x256xf32> -> vector<8x256xf32>
    %149 = arith.addf %144, %148 : vector<8x256xf32>
    %c244_i32 = arith.constant 244 : i32
    %150 = tpu.dynamic_rotate %119 by %c244_i32 dim 1 : vector<8x256xf32>, i32 -> vector<8x256xf32>
    %c0_48 = arith.constant 0 : index
    %c6 = arith.constant 6 : index
    %c0_49 = arith.constant 0 : index
    %c0_50 = arith.constant 0 : index
    %151 = vector.load %arg2[%c0_48, %c6, %c0_49, %c0_50] : memref<2x9x8x8xf32, #tpu.memory_space<vmem>>, vector<1x1x8x8xf32>
    %152 = vector.shape_cast %151 : vector<1x1x8x8xf32> to vector<8x8xf32>
    %cst_51 = arith.constant dense<0.000000e+00> : vector<8x256xf32>
    %153 = tpu.matmul %152, %150, %cst_51 {dimension_numbers = #tpu.dot_dimension_numbers<[1], [0], [0], [1], [0, 0, 1, 1], [], []>} : vector<8x8xf32>, vector<8x256xf32>, vector<8x256xf32> -> vector<8x256xf32>
    %154 = arith.addf %149, %153 : vector<8x256xf32>
    %c243_i32 = arith.constant 243 : i32
    %155 = tpu.dynamic_rotate %119 by %c243_i32 dim 1 : vector<8x256xf32>, i32 -> vector<8x256xf32>
    %c0_52 = arith.constant 0 : index
    %c7 = arith.constant 7 : index
    %c0_53 = arith.constant 0 : index
    %c0_54 = arith.constant 0 : index
    %156 = vector.load %arg2[%c0_52, %c7, %c0_53, %c0_54] : memref<2x9x8x8xf32, #tpu.memory_space<vmem>>, vector<1x1x8x8xf32>
    %157 = vector.shape_cast %156 : vector<1x1x8x8xf32> to vector<8x8xf32>
    %cst_55 = arith.constant dense<0.000000e+00> : vector<8x256xf32>
    %158 = tpu.matmul %157, %155, %cst_55 {dimension_numbers = #tpu.dot_dimension_numbers<[1], [0], [0], [1], [0, 0, 1, 1], [], []>} : vector<8x8xf32>, vector<8x256xf32>, vector<8x256xf32> -> vector<8x256xf32>
    %159 = arith.addf %154, %158 : vector<8x256xf32>
    %c242_i32 = arith.constant 242 : i32
    %160 = tpu.dynamic_rotate %119 by %c242_i32 dim 1 : vector<8x256xf32>, i32 -> vector<8x256xf32>
    %c0_56 = arith.constant 0 : index
    %c8_57 = arith.constant 8 : index
    %c0_58 = arith.constant 0 : index
    %c0_59 = arith.constant 0 : index
    %161 = vector.load %arg2[%c0_56, %c8_57, %c0_58, %c0_59] : memref<2x9x8x8xf32, #tpu.memory_space<vmem>>, vector<1x1x8x8xf32>
    %162 = vector.shape_cast %161 : vector<1x1x8x8xf32> to vector<8x8xf32>
    %cst_60 = arith.constant dense<0.000000e+00> : vector<8x256xf32>
    %163 = tpu.matmul %162, %160, %cst_60 {dimension_numbers = #tpu.dot_dimension_numbers<[1], [0], [0], [1], [0, 0, 1, 1], [], []>} : vector<8x8xf32>, vector<8x256xf32>, vector<8x256xf32> -> vector<8x256xf32>
    %164 = arith.addf %159, %163 : vector<8x256xf32>
    %165 = vector.broadcast %114 : vector<8x1xf32> to vector<8x256xf32>
    %166 = arith.mulf %164, %165 : vector<8x256xf32>
    %167 = vector.broadcast %115 : vector<8x1xf32> to vector<8x256xf32>
    %168 = arith.addf %166, %167 : vector<8x256xf32>
    %cst_61 = arith.constant 0.000000e+00 : f32
    %169 = vector.broadcast %cst_61 : f32 to vector<8x256xf32>
    %170 = arith.maximumf %168, %169 : vector<8x256xf32>
    %171 = vector.broadcast %91 : vector<1x256xf32> to vector<8x256xf32>
    %172 = arith.mulf %170, %171 : vector<8x256xf32>
    %cst_62 = arith.constant 0.000000e+00 : f32
    %173 = vector.broadcast %cst_62 : f32 to vector<8x256xf32>
    %c14_i32_63 = arith.constant 14 : i32
    %174 = tpu.dynamic_rotate %172 by %c14_i32_63 dim 1 : vector<8x256xf32>, i32 -> vector<8x256xf32>
    %c1_64 = arith.constant 1 : index
    %c0_65 = arith.constant 0 : index
    %c0_66 = arith.constant 0 : index
    %c0_67 = arith.constant 0 : index
    %175 = vector.load %arg2[%c1_64, %c0_65, %c0_66, %c0_67] : memref<2x9x8x8xf32, #tpu.memory_space<vmem>>, vector<1x1x8x8xf32>
    %176 = vector.shape_cast %175 : vector<1x1x8x8xf32> to vector<8x8xf32>
    %cst_68 = arith.constant dense<0.000000e+00> : vector<8x256xf32>
    %177 = tpu.matmul %176, %174, %cst_68 {dimension_numbers = #tpu.dot_dimension_numbers<[1], [0], [0], [1], [0, 0, 1, 1], [], []>} : vector<8x8xf32>, vector<8x256xf32>, vector<8x256xf32> -> vector<8x256xf32>
    %178 = arith.addf %173, %177 : vector<8x256xf32>
    %c13_i32_69 = arith.constant 13 : i32
    %179 = tpu.dynamic_rotate %172 by %c13_i32_69 dim 1 : vector<8x256xf32>, i32 -> vector<8x256xf32>
    %c1_70 = arith.constant 1 : index
    %c1_71 = arith.constant 1 : index
    %c0_72 = arith.constant 0 : index
    %c0_73 = arith.constant 0 : index
    %180 = vector.load %arg2[%c1_70, %c1_71, %c0_72, %c0_73] : memref<2x9x8x8xf32, #tpu.memory_space<vmem>>, vector<1x1x8x8xf32>
    %181 = vector.shape_cast %180 : vector<1x1x8x8xf32> to vector<8x8xf32>
    %cst_74 = arith.constant dense<0.000000e+00> : vector<8x256xf32>
    %182 = tpu.matmul %181, %179, %cst_74 {dimension_numbers = #tpu.dot_dimension_numbers<[1], [0], [0], [1], [0, 0, 1, 1], [], []>} : vector<8x8xf32>, vector<8x256xf32>, vector<8x256xf32> -> vector<8x256xf32>
    %183 = arith.addf %178, %182 : vector<8x256xf32>
    %c12_i32_75 = arith.constant 12 : i32
    %184 = tpu.dynamic_rotate %172 by %c12_i32_75 dim 1 : vector<8x256xf32>, i32 -> vector<8x256xf32>
    %c1_76 = arith.constant 1 : index
    %c2_77 = arith.constant 2 : index
    %c0_78 = arith.constant 0 : index
    %c0_79 = arith.constant 0 : index
    %185 = vector.load %arg2[%c1_76, %c2_77, %c0_78, %c0_79] : memref<2x9x8x8xf32, #tpu.memory_space<vmem>>, vector<1x1x8x8xf32>
    %186 = vector.shape_cast %185 : vector<1x1x8x8xf32> to vector<8x8xf32>
    %cst_80 = arith.constant dense<0.000000e+00> : vector<8x256xf32>
    %187 = tpu.matmul %186, %184, %cst_80 {dimension_numbers = #tpu.dot_dimension_numbers<[1], [0], [0], [1], [0, 0, 1, 1], [], []>} : vector<8x8xf32>, vector<8x256xf32>, vector<8x256xf32> -> vector<8x256xf32>
    %188 = arith.addf %183, %187 : vector<8x256xf32>
    %c1_i32_81 = arith.constant 1 : i32
    %189 = tpu.dynamic_rotate %172 by %c1_i32_81 dim 1 : vector<8x256xf32>, i32 -> vector<8x256xf32>
    %c1_82 = arith.constant 1 : index
    %c3_83 = arith.constant 3 : index
    %c0_84 = arith.constant 0 : index
    %c0_85 = arith.constant 0 : index
    %190 = vector.load %arg2[%c1_82, %c3_83, %c0_84, %c0_85] : memref<2x9x8x8xf32, #tpu.memory_space<vmem>>, vector<1x1x8x8xf32>
    %191 = vector.shape_cast %190 : vector<1x1x8x8xf32> to vector<8x8xf32>
    %cst_86 = arith.constant dense<0.000000e+00> : vector<8x256xf32>
    %192 = tpu.matmul %191, %189, %cst_86 {dimension_numbers = #tpu.dot_dimension_numbers<[1], [0], [0], [1], [0, 0, 1, 1], [], []>} : vector<8x8xf32>, vector<8x256xf32>, vector<8x256xf32> -> vector<8x256xf32>
    %193 = arith.addf %188, %192 : vector<8x256xf32>
    %c1_87 = arith.constant 1 : index
    %c4_88 = arith.constant 4 : index
    %c0_89 = arith.constant 0 : index
    %c0_90 = arith.constant 0 : index
    %194 = vector.load %arg2[%c1_87, %c4_88, %c0_89, %c0_90] : memref<2x9x8x8xf32, #tpu.memory_space<vmem>>, vector<1x1x8x8xf32>
    %195 = vector.shape_cast %194 : vector<1x1x8x8xf32> to vector<8x8xf32>
    %cst_91 = arith.constant dense<0.000000e+00> : vector<8x256xf32>
    %196 = tpu.matmul %195, %172, %cst_91 {dimension_numbers = #tpu.dot_dimension_numbers<[1], [0], [0], [1], [0, 0, 1, 1], [], []>} : vector<8x8xf32>, vector<8x256xf32>, vector<8x256xf32> -> vector<8x256xf32>
    %197 = arith.addf %193, %196 : vector<8x256xf32>
    %c255_i32_92 = arith.constant 255 : i32
    %198 = tpu.dynamic_rotate %172 by %c255_i32_92 dim 1 : vector<8x256xf32>, i32 -> vector<8x256xf32>
    %c1_93 = arith.constant 1 : index
    %c5_94 = arith.constant 5 : index
    %c0_95 = arith.constant 0 : index
    %c0_96 = arith.constant 0 : index
    %199 = vector.load %arg2[%c1_93, %c5_94, %c0_95, %c0_96] : memref<2x9x8x8xf32, #tpu.memory_space<vmem>>, vector<1x1x8x8xf32>
    %200 = vector.shape_cast %199 : vector<1x1x8x8xf32> to vector<8x8xf32>
    %cst_97 = arith.constant dense<0.000000e+00> : vector<8x256xf32>
    %201 = tpu.matmul %200, %198, %cst_97 {dimension_numbers = #tpu.dot_dimension_numbers<[1], [0], [0], [1], [0, 0, 1, 1], [], []>} : vector<8x8xf32>, vector<8x256xf32>, vector<8x256xf32> -> vector<8x256xf32>
    %202 = arith.addf %197, %201 : vector<8x256xf32>
    %c244_i32_98 = arith.constant 244 : i32
    %203 = tpu.dynamic_rotate %172 by %c244_i32_98 dim 1 : vector<8x256xf32>, i32 -> vector<8x256xf32>
    %c1_99 = arith.constant 1 : index
    %c6_100 = arith.constant 6 : index
    %c0_101 = arith.constant 0 : index
    %c0_102 = arith.constant 0 : index
    %204 = vector.load %arg2[%c1_99, %c6_100, %c0_101, %c0_102] : memref<2x9x8x8xf32, #tpu.memory_space<vmem>>, vector<1x1x8x8xf32>
    %205 = vector.shape_cast %204 : vector<1x1x8x8xf32> to vector<8x8xf32>
    %cst_103 = arith.constant dense<0.000000e+00> : vector<8x256xf32>
    %206 = tpu.matmul %205, %203, %cst_103 {dimension_numbers = #tpu.dot_dimension_numbers<[1], [0], [0], [1], [0, 0, 1, 1], [], []>} : vector<8x8xf32>, vector<8x256xf32>, vector<8x256xf32> -> vector<8x256xf32>
    %207 = arith.addf %202, %206 : vector<8x256xf32>
    %c243_i32_104 = arith.constant 243 : i32
    %208 = tpu.dynamic_rotate %172 by %c243_i32_104 dim 1 : vector<8x256xf32>, i32 -> vector<8x256xf32>
    %c1_105 = arith.constant 1 : index
    %c7_106 = arith.constant 7 : index
    %c0_107 = arith.constant 0 : index
    %c0_108 = arith.constant 0 : index
    %209 = vector.load %arg2[%c1_105, %c7_106, %c0_107, %c0_108] : memref<2x9x8x8xf32, #tpu.memory_space<vmem>>, vector<1x1x8x8xf32>
    %210 = vector.shape_cast %209 : vector<1x1x8x8xf32> to vector<8x8xf32>
    %cst_109 = arith.constant dense<0.000000e+00> : vector<8x256xf32>
    %211 = tpu.matmul %210, %208, %cst_109 {dimension_numbers = #tpu.dot_dimension_numbers<[1], [0], [0], [1], [0, 0, 1, 1], [], []>} : vector<8x8xf32>, vector<8x256xf32>, vector<8x256xf32> -> vector<8x256xf32>
    %212 = arith.addf %207, %211 : vector<8x256xf32>
    %c242_i32_110 = arith.constant 242 : i32
    %213 = tpu.dynamic_rotate %172 by %c242_i32_110 dim 1 : vector<8x256xf32>, i32 -> vector<8x256xf32>
    %c1_111 = arith.constant 1 : index
    %c8_112 = arith.constant 8 : index
    %c0_113 = arith.constant 0 : index
    %c0_114 = arith.constant 0 : index
    %214 = vector.load %arg2[%c1_111, %c8_112, %c0_113, %c0_114] : memref<2x9x8x8xf32, #tpu.memory_space<vmem>>, vector<1x1x8x8xf32>
    %215 = vector.shape_cast %214 : vector<1x1x8x8xf32> to vector<8x8xf32>
    %cst_115 = arith.constant dense<0.000000e+00> : vector<8x256xf32>
    %216 = tpu.matmul %215, %213, %cst_115 {dimension_numbers = #tpu.dot_dimension_numbers<[1], [0], [0], [1], [0, 0, 1, 1], [], []>} : vector<8x8xf32>, vector<8x256xf32>, vector<8x256xf32> -> vector<8x256xf32>
    %217 = arith.addf %212, %216 : vector<8x256xf32>
    %218 = vector.broadcast %116 : vector<8x1xf32> to vector<8x256xf32>
    %219 = arith.mulf %217, %218 : vector<8x256xf32>
    %220 = vector.broadcast %117 : vector<8x1xf32> to vector<8x256xf32>
    %221 = arith.addf %219, %220 : vector<8x256xf32>
    %222 = vector.broadcast %113 : vector<1x256xf32> to vector<8x256xf32>
    %223 = arith.mulf %221, %222 : vector<8x256xf32>
    %224 = arith.addf %223, %1 : vector<8x256xf32>
    %cst_116 = arith.constant 0.000000e+00 : f32
    %225 = vector.broadcast %cst_116 : f32 to vector<8x256xf32>
    %226 = arith.maximumf %224, %225 : vector<8x256xf32>
    %c0_117 = arith.constant 0 : index
    %c0_118 = arith.constant 0 : index
    %c0_119 = arith.constant 0 : index
    %227 = vector.load %arg5[%c0_117, %c0_118, %c0_119] : memref<1x8x256xf32, #tpu.memory_space<vmem>>, vector<1x8x256xf32>
    %228 = vector.shape_cast %227 : vector<1x8x256xf32> to vector<8x256xf32>
    %229 = vector.shape_cast %226 : vector<8x256xf32> to vector<1x8x256xf32>
    tpu.vector_store %arg5[%c0_117, %c0_118, %c0_119], %229 {strides = array<i32>} : memref<1x8x256xf32, #tpu.memory_space<vmem>>, vector<1x8x256xf32>,
    return
  }
  func.func @transform_0(%arg0: i32) -> (i32, i32, i32) {
    %c0_i32 = arith.constant 0 : i32
    %c0_i32_0 = arith.constant 0 : i32
    %c0_i32_1 = arith.constant 0 : i32
    return %arg0, %c0_i32, %c0_i32_0 : i32, i32, i32
  }
  func.func @transform_1(%arg0: i32) -> (i32, i32, i32, i32) {
    %c0_i32 = arith.constant 0 : i32
    %c0_i32_0 = arith.constant 0 : i32
    %c0_i32_1 = arith.constant 0 : i32
    %c0_i32_2 = arith.constant 0 : i32
    %c0_i32_3 = arith.constant 0 : i32
    return %c0_i32, %c0_i32_0, %c0_i32_1, %c0_i32_2 : i32, i32, i32, i32
  }
  func.func @transform_2(%arg0: i32) -> (i32, i32) {
    %c0_i32 = arith.constant 0 : i32
    %c0_i32_0 = arith.constant 0 : i32
    %c0_i32_1 = arith.constant 0 : i32
    return %c0_i32, %c0_i32_0 : i32, i32
  }
  func.func @transform_3(%arg0: i32) -> (i32, i32) {
    %c0_i32 = arith.constant 0 : i32
    %c0_i32_0 = arith.constant 0 : i32
    %c0_i32_1 = arith.constant 0 : i32
    return %c0_i32, %c0_i32_0 : i32, i32
  }
  func.func @transform_4(%arg0: i32) -> (i32, i32, i32) {
    %c0_i32 = arith.constant 0 : i32
    %c0_i32_0 = arith.constant 0 : i32
    %c0_i32_1 = arith.constant 0 : i32
    return %arg0, %c0_i32, %c0_i32_0 : i32, i32, i32
  }
}

</mosaic_0001>

<bundles_post_ra>
// kernel: tpu_custom_call.1
= control target key start
LH: loop header
LB: loop body
LE: loop exit
PB: predicated region body
PF: predicated region fallthrough
CT: control target
= control target key end

     0   :  { %9 = vsyncpa [#allocation3], 0  ;;  %s2719_s0 = inlined_call_operand.vmem [shape: f32[2,8,256], index: 0, kind: input, shape index: {}]   ;;  %s2720_s1 = inlined_call_operand.vmem [shape: f32[2,9,8,8], index: 1, kind: input, shape index: {}]   ;;  %s2721_s2 = inlined_call_operand.vmem [shape: f32[8,11], index: 2, kind: input, shape index: {}]   ;;  %s2722_s3 = inlined_call_operand.vmem [shape: f32[8,4], index: 3, kind: input, shape index: {}]   ;;  %s2723_s4 = inlined_call_operand.hbm [shape: f32[2,8,256], index: 4, kind: output, shape index: {}]  }
   0x1   :  { %11 = vsyncpa [#allocation3 + $0x1], 0  ;;  %s2335_s15 = smov 0   ;;  %s2337_s16 = smov 0  }
   0x2   :  { %s2339_s17 = smov 0   ;;  %s2341_s18 = smov 0  }
   0x3 LB: > { %s2356_s19 = sadd.s32 4294967295, %s2291_s18   ;;  %s2069_s20 = sadd.s32 4294967294, %s2291_s18   ;;  %s2291_s18 = sphi %s2341_s18, %s2744_s18   ;;  %s2287_s17 = sphi %s2339_s17, %s2743_s17   ;;  %s2283_s16 = sphi %s2337_s16, %s2742_s16   ;;  %s2279_s15 = sphi %s2335_s15, %s2741_s15  }
   0x4   : > { %s2360_s21 = sadd.s32 1, %s2291_s18   ;;  %s113_s22 = sadd.s32 1, %s2287_s17 }
   0x5   : > { %s110_s23 = ssub.s32 %s2291_s18, %s2360_s21  ;;  %p123_p0 = scmp.ne.s32.totalorder %s2287_s17, %s2283_s16 }
   0x6   : > { %p111_p1 = scmp.eq.s32.totalorder %s110_s23, 0  ;;  %p124_p2 = scmp.eq.s32.totalorder %s2356_s19, 1 }
   0x7   : > { %p129_p3 = scmp.ne.s32.totalorder %s2283_s16, %s2279_s15  ;;  %p130_p4 = scmp.eq.s32.totalorder %s2069_s20, 1 }
   0x8   : > { %s2371_s24 = scalar_select %p111_p1, %s2287_s17, %s113_s22  }
   0x9   : > { %p2373_p5 = por %p124_p2, %p123_p0  ;;  %p2377_p6 = por %p130_p4, %p129_p3 }
   0xa   : > { %p2072_p7 = scmp.ge.s32.totalorder %s2291_s18, 1  ;;  %p165_p8 = scmp.lt.s32.totalorder %s2291_s18, 3 }
   0xc   : > { %p166_p9 = pnand %p2072_p7, %p165_p8 }
   0xd   : > { %p191_p10 = scmp.lt.s32.totalorder (!%p166_p9), %s2356_s19, 1  ;;  %v2293_v0 = vmov (!%p166_p9), 0.0   ;;  %v333_v1 = vld [vmem:[%s2721_s2] sm:$0xff] (!%p166_p9)  ;;  %v2294_v2 = vmov (!%p166_p9), 8   ;;  %v2295_v4 = vmov (!%p166_p9), 10   ;;  %vm340_vm0 = vcmask (!%p166_p9), 64512  }
   0xe   : > { %169 = sbr.rel (%p166_p9) target bundleno = 1107 (0x453), region = 36  ;;  %407 = vmatprep.mubr.f32.mxu0 (!%p166_p9), %v2293_v0  ;;  %2218 = vset.pattern.permute.xlu0 (!%p166_p9), %v2294_v2  ;;  %v334_v3 = vld [vmem:[%s2721_s2] sm:$0x1] (!%p166_p9)  ;;  %v2296_v7 = vmov (!%p166_p9), 9   ;;  %v198_v35 = vlaneseq (!%p166_p9)  ;;  %s2297_s10 = smov (!%p166_p9), 14   ;;  %v2305_v49 = vmov (!%p166_p9), 0  }
   0xf   : > { %337 = vperm.xlu0 (!%p166_p9), %2218, %v333_v1   ;;  %2220 = vset.pattern.permute.xlu1 (!%p166_p9), %v2295_v4  ;;  %s2298_s11 = smov (!%p166_p9), 13   ;;  %s2299_s12 = smov (!%p166_p9), 12   ;;  %v2451_v48 = vld [vmem:[%s2722_s3] sm:$0xff] (!%p166_p9)  ;;  %v2306_v50 = vmov (!%p166_p9), 1   ;;  %v2089_v57 = vld [vmem:[%s2720_s1 + $0x8] sm:$0xff] (!%p166_p9) }
  0x10   : > { %436 = vperm.xlu1 (!%p166_p9), %2220, %v334_v3   ;;  %544 = vmatprep.mubr.f32.mxu1 (!%p166_p9), %v2293_v0  ;;  %v451_v36 = vshrl.u32 (!%p166_p9), %v198_v35, 7  ;;  %s2300_s13 = smov (!%p166_p9), 1   ;;  %s2301_s14 = smov (!%p166_p9), 127   ;;  %v2455_v51 = vand.u32 (!%p166_p9), 127, %v198_v35 }
  0x11   : > { %s2302_s20 = smov (!%p166_p9), 116   ;;  %s2303_s22 = smov (!%p166_p9), 115  }
  0x12   : > { %v452_v40 = vsub.s32 (!%p166_p9), 0, %v451_v36  ;;  %s2304_s23 = smov (!%p166_p9), 114   ;;  %vm472_vm1 = vcmp.lt.s32.totalorder (!%p166_p9), %v2455_v51, 13  ;;  %vm464_vm2 = vcmp.lt.s32.totalorder (!%p166_p9), %v2455_v51, 14  ;;  %vm2728_vm3 = vcmp.lt.s32.totalorder (!%p166_p9), %v2455_v51, 12 }
  0x13   : > { %2219 = vset.pattern.permute.xlu0 (!%p166_p9), %v2296_v7  ;;  %vm2727_vm4 = vcmp.lt.s32.totalorder (!%p166_p9), %v2455_v51, 1  ;;  %vm2726_vm5 = vcmp.lt.s32.totalorder (!%p166_p9), %v2455_v51, 127  ;;  %vm287_vm6 = vcmp.lt.s32.totalorder (!%p166_p9), %v2455_v51, 116  ;;  %vm2725_vm7 = vcmp.lt.s32.totalorder (!%p166_p9), %v2455_v51, 115 }
  0x14   : > { %417 = vperm.xlu0 (!%p166_p9), %2219, %v333_v1   ;;  %2222 = vset.pattern.permute.xlu1 (!%p166_p9), %v2306_v50  ;;  %vm2724_vm8 = vcmp.lt.s32.totalorder (!%p166_p9), %v2455_v51, 114  ;;  %vm201_vm9 = vcmp.ge.s32.totalorder (!%p166_p9), %v2455_v51, 14  ;;  %vm203_vm10 = vcmp.lt.s32.totalorder (!%p166_p9), %v2455_v51, 25  ;;  %vm213_vm11 = vcmp.ge.s32.totalorder (!%p166_p9), %v2455_v51, 27 }
  0x15   : > { %s192_s5 = scalar_select %p191_p10, %s2356_s19, 1  ;;  %vm215_vm12 = vcmp.lt.s32.totalorder %v2455_v51, 38  ;;  %vm205_vm13 = vmand %vm201_vm9, %vm203_vm10  ;;  %vm225_vm15 = vcmp.ge.s32.totalorder %v2455_v51, 40  ;;  %vm249_vm9 = vcmp.ge.s32.totalorder %v2455_v51, 66  ;;  %vm251_vm10 = vcmp.lt.s32.totalorder %v2455_v51, 77 }
  0x16   : > { %vm217_vm14 = vmand %vm213_vm11, %vm215_vm12  ;;  %vm261_vm12 = vcmp.ge.s32.totalorder %v2455_v51, 79 }
  0x17   : > { %s2129_s6 = sshll.u32 %s192_s5, 4  ;;  %vm253_vm11 = vmand %vm249_vm9, %vm251_vm10  ;;  %s2309_s5 = smov [#allocation2]  }
  0x18   : > { %s195_s9 = scalar_lea.vmem %s2719_s0, %s2129_s6  ;;  %2221 = vset.pattern.permute.xlu0 %v2305_v49  ;;  %s2233_s6 = sshll.u32 %s2309_s5, 4  ;;  %s2234_s6 = int_to_ptr.vmem [resolvable:$false] %s2233_s6 }
  0x19   : > { %v2396_v5 = vld [vmem:[%s195_s9 + $0x8] sm:$0xff]  ;;  %v2398_v6 = vld [vmem:[%s195_s9] sm:$0xff]  ;;  %s2235_s7 = scalar_lea.vmem %s2234_s6, 512 }
  0x1a   : > { %343 = vmatprep.subr.mxu0 %v2396_v5 }
  0x1b   : > { %344 = vmatpush1.msra.mxu0 %v2398_v6 }
  0x1c   : > { %2088 = vmatmul.mubr.msk.f32.vlgmr.msra.gmra.mrb[0].mxu0 %vm340_vm0, %v333_v1  ;;  %v467_v1 = vld [vmem:[%s2720_s1] sm:$0xff] }
  0x1d   : > { %1312 = vmatprep.mubr.f32.mxu0 %v2293_v0 }
  0x8e   : > { %v338_v8 = vpop.permute.xlu0 %337 }
  0x8f   : > { %v437_v27 = vpop.permute.xlu1 %436 }
  0x93   : > { %v418_v13 = vpop.permute.xlu0 %417 }
  0xef   : > { %v409_v9 = vpop.f32.mrb[0].mxu0 }
  0xf0   : > { %v410_v10 = vadd.f32 %v409_v9, %v338_v8  ;;  %v411_v11 = vpop.f32.mrb[1].mxu0 }
  0xf1   : > { %v412_v12 = vadd.f32 %v411_v11, %v338_v8  ;;  %v2092_v8 = vld [vmem:[%s2720_s1 + $0x10] sm:$0xff] }
  0xf2   : > { %v414_v14 = vmax.f32 %v410_v10, 0.0  ;;  %v2094_v10 = vld [vmem:[%s2720_s1 + $0x18] sm:$0xff] }
  0xf3   : > { %v415_v15 = vmax.f32 %v412_v12, 0.0 }
  0xf4   : > { %v420_v16 = vmul.f32 %v418_v13, %v414_v14  ;;  %v2096_v14 = vld [vmem:[%s2720_s1 + $0x20] sm:$0xff] }
  0xf5   : > { %v421_v17 = vmul.f32 %v418_v13, %v415_v15 }
  0xf6   : > { %v422_v18 = vrot.slane %v420_v16, 4 }
  0xf7   : > { %v428_v19 = vrot.slane %v421_v17, 4 }
  0xf8   : > { %v423_v20 = vadd.f32 %v422_v18, %v420_v16 }
  0xf9   : > { %v429_v21 = vadd.f32 %v428_v19, %v421_v17  ;;  %v2098_v19 = vld [vmem:[%s2720_s1 + $0x28] sm:$0xff] }
  0xfa   : > { %v424_v22 = vrot.slane %v423_v20, 2 }
  0xfb   : > { %v430_v23 = vrot.slane %v429_v21, 2 }
  0xfc   : > { %v425_v24 = vadd.f32 %v424_v22, %v423_v20 }
  0xfd   : > { %v431_v25 = vadd.f32 %v430_v23, %v429_v21 }
  0xfe   : > { %v426_v26 = vrot.slane %v425_v24, 1 }
  0xff   : > { %v432_v28 = vrot.slane %v431_v25, 1 }
 0x100   : > { %v427_v29 = vadd.f32 %v426_v26, %v425_v24  ;;  %v2100_v24 = vld [vmem:[%s2720_s1 + $0x30] sm:$0xff] }
 0x101   : > { %v433_v30 = vadd.f32 %v432_v28, %v431_v25 }
 0x102   : > { %v439_v31 = vadd.f32 %v437_v27, %v427_v29  ;;  %v2102_v29 = vld [vmem:[%s2720_s1 + $0x38] sm:$0xff] }
 0x103   : > { %v440_v32 = vadd.f32 %v437_v27, %v433_v30 }
 0x104   : > { %v441_v33 = vmul.f32 0.5, %v439_v31  ;;  %v2104_v31 = vld [vmem:[%s2720_s1 + $0x40] sm:$0xff] }
 0x105   : > { %v442_v34 = vmul.f32 0.5, %v440_v32  ;;  %v2076_v32 = vsel %vm205_vm13, 1.0, %v2293_v0 }
 0x106   : > { %2225 = vtanh.f32 %v441_v33  ;;  %v2077_v33 = vsel %vm217_vm14, 1.0, %v2293_v0  ;;  %vm273_vm14 = vcmp.ge.s32.totalorder %v2455_v51, 92 }
 0x107   : > { %2227 = vtanh.f32 %v442_v34  ;;  %v223_v34 = vadd.f32 %v2077_v33, %v2076_v32 }
 0x110   : > { %v2226_v37 = vpop.eup %2225 }
 0x111   : > { %v2228_v38 = vpop.eup %2227  ;;  %v445_v39 = vmul.f32 0.5, %v2226_v37 }
 0x112   : > { %v446_v41 = vmul.f32 0.5, %v2228_v38 }
 0x113   : > { %v447_v42 = vadd.f32 0.5, %v445_v39  ;;  %v2080_v39 = vsel %vm253_vm11, 1.0, %v2293_v0 }
 0x114   : > { %v448_v43 = vadd.f32 0.5, %v446_v41 }
 0x115   : > { %v2404_v44 = vrot.slane %v447_v42, %v452_v40 }
 0x116   : > { %v2406_v45 = vrot.slane %v448_v43, %v452_v40  ;;  %v200_v40 = vadd.s32 128, %v2455_v51 }
 0x117   : > { %v2410_v46 = vmul.f32 %v2404_v44, %v2398_v6 }
 0x118   : > { %v2418_v47 = vmul.f32 %v2406_v45, %v2396_v5  ;;  %vm300_vm10 = vcmp.lt.s32.totalorder %v200_v40, 129 }
 0x119   : > { %460 = vrot.lane.b32.xlu0 %v2410_v46, %s2297_s10  ;;  %468 = vrot.lane.b32.xlu1 %v2410_v46, %s2298_s11  ;;  %v2085_v50 = vsel %vm300_vm10, 1.0, %v2293_v0 }
 0x11d   : > { %625 = vrot.lane.b32.xlu0 %v2410_v46, %s2299_s12  ;;  %470 = vrot.lane.b32.xlu1 %v2418_v47, %s2298_s11 }
 0x121   : > { %710 = vrot.lane.b32.xlu0 %v2410_v46, %s2300_s13  ;;  %462 = vrot.lane.b32.xlu1 %v2418_v47, %s2297_s10 }
 0x125   : > { %873 = vrot.lane.b32.xlu0 %v2410_v46, %s2301_s14  ;;  %627 = vrot.lane.b32.xlu1 %v2418_v47, %s2299_s12 }
 0x129   : > { %958 = vrot.lane.b32.xlu0 %v2410_v46, %s2302_s20  ;;  %712 = vrot.lane.b32.xlu1 %v2418_v47, %s2300_s13 }
 0x12d   : > { %1042 = vrot.lane.b32.xlu0 %v2410_v46, %s2303_s22  ;;  %875 = vrot.lane.b32.xlu1 %v2418_v47, %s2301_s14 }
 0x131   : > { %1127 = vrot.lane.b32.xlu0 %v2410_v46, %s2304_s23  ;;  %960 = vrot.lane.b32.xlu1 %v2418_v47, %s2302_s20 }
 0x135   : > { %1044 = vrot.lane.b32.xlu1 %v2418_v47, %s2303_s22  ;;  %1214 = vperm.xlu0 %2221, %v2451_v48  }
 0x139   : > { %1129 = vrot.lane.b32.xlu1 %v2418_v47, %s2304_s23 }
 0x13d   : > { %1220 = vperm.xlu1 %2222, %v2451_v48  }
 0x18b   : > { %v469_v52 = vpop.permute.xlu1 %468  ;;  %v461_v53 = vpop.permute.xlu0 %460 }
 0x18f   : > { %v471_v54 = vpop.permute.xlu1 %470  ;;  %v626_v61 = vpop.permute.xlu0 %625 }
 0x190   : > { %v473_v55 = vsel %vm472_vm1, %v469_v52, %v471_v54  ;;  %v474_v56 = vsel %vm472_vm1, %v471_v54, %v469_v52 }
 0x191   : > { %480 = vmatprep.subr.mxu1 %v473_v55 }
 0x192   : > { %481 = vmatpush1.msra.mxu1 %v474_v56 }
 0x193   : > { %2090 = vmatmul.mubr.msk.f32.vlgmr.msra.gmra.mrb[0].mxu1 %vm340_vm0, %v2089_v57  ;;  %v463_v58 = vpop.permute.xlu1 %462  ;;  %v711_v2 = vpop.permute.xlu0 %710 }
 0x194   : > { %v466_v59 = vsel %vm464_vm2, %v463_v58, %v461_v53  ;;  %v465_v60 = vsel %vm464_vm2, %v461_v53, %v463_v58  ;;  %618 = vmatprep.mubr.f32.mxu1 %v2293_v0 }
 0x195   : > { %554 = vmatprep.subr.mxu1 %v465_v60 }
 0x196   : > { %555 = vmatpush1.msra.mxu1 %v466_v59 }
 0x197   : > { %v628_v62 = vpop.permute.xlu1 %627  ;;  %v874_v12 = vpop.permute.xlu0 %873 }
 0x198   : > { %v630_v63 = vsel %vm2728_vm3, %v626_v61, %v628_v62  ;;  %v631_v3 = vsel %vm2728_vm3, %v628_v62, %v626_v61 }
 0x199   : > { %637 = vmatprep.subr.mxu1 %v630_v63 }
 0x19b   : > { %2091 = vmatmul.mubr.msk.f32.vlgmr.msra.gmra.mrb[0].mxu1 %vm340_vm0, %v467_v1  ;;  %v713_v4 = vpop.permute.xlu1 %712  ;;  %v959_v16 = vpop.permute.xlu0 %958 }
 0x19c   : > { %638 = vmatpush1.msra.mxu1 %v631_v3  ;;  %v715_v7 = vsel %vm2727_vm4, %v711_v2, %v713_v4  ;;  %701 = vmatprep.mubr.f32.mxu1 %v2293_v0  ;;  %v716_v9 = vsel %vm2727_vm4, %v713_v4, %v711_v2  ;;  %vm239_vm4 = vcmp.lt.s32.totalorder %v2455_v51, 64 }
 0x19d   : > { %722 = vmatprep.subr.mxu1 %v715_v7 }
 0x19f   : > { %v876_v11 = vpop.permute.xlu1 %875  ;;  %v1043_v21 = vpop.permute.xlu0 %1042 }
 0x1a0   : > { %v879_v13 = vsel %vm2726_vm5, %v876_v11, %v874_v12  ;;  %v878_v17 = vsel %vm2726_vm5, %v874_v12, %v876_v11  ;;  %vm237_vm5 = vcmp.ge.s32.totalorder %v2455_v51, 53  ;;  %v2308_v11 = vmov 3  }
 0x1a1   : > { %vm241_vm3 = vmand %vm237_vm5, %vm239_vm4  ;;  %vm275_vm4 = vcmp.lt.s32.totalorder %v2455_v51, 103  ;;  %2224 = vset.pattern.permute.xlu0 %v2308_v11 }
 0x1a2   : > { %v2079_v37 = vsel %vm241_vm3, 1.0, %v2293_v0  ;;  %vm277_vm5 = vmand %vm273_vm14, %vm275_vm4  ;;  %vm285_vm3 = vcmp.ge.s32.totalorder %v2455_v51, 105 }
 0x1a3   : > { %2093 = vmatmul.mubr.msk.f32.vlgmr.msra.gmra.mrb[0].mxu1 %vm340_vm0, %v2092_v8  ;;  %v961_v15 = vpop.permute.xlu1 %960  ;;  %v1128_v26 = vpop.permute.xlu0 %1127  ;;  %vm289_vm9 = vmand %vm285_vm3, %vm287_vm6  ;;  %vm2735_vm3 = vcmp.lt.s32.totalorder %v2455_v51, 127 }
 0x1a4   : > { %723 = vmatpush1.msra.mxu1 %v716_v9  ;;  %786 = vmatprep.mubr.f32.mxu1 %v2293_v0  ;;  %v963_v18 = vsel %vm287_vm6, %v961_v15, %v959_v16  ;;  %v962_v22 = vsel %vm287_vm6, %v959_v16, %v961_v15  ;;  %v2083_v49 = vsel %vm289_vm9, 1.0, %v2293_v0  ;;  %v2107_v16 = vld [vmem:[%s2720_s1 + $0x50] sm:$0xff] }
 0x1a5   : > { %800 = vmatprep.subr.mxu1 %v2418_v47 }
 0x1a7   : > { %v1045_v20 = vpop.permute.xlu1 %1044 }
 0x1a8   : > { %v1048_v23 = vsel %vm2725_vm7, %v1045_v20, %v1043_v21  ;;  %v1047_v27 = vsel %vm2725_vm7, %v1043_v21, %v1045_v20 }
 0x1ab   : > { %2095 = vmatmul.mubr.msk.f32.vlgmr.msra.gmra.mrb[0].mxu1 %vm340_vm0, %v2094_v10  ;;  %v1130_v25 = vpop.permute.xlu1 %1129  ;;  %v2307_v10 = vmov 2  }
 0x1ac   : > { %801 = vmatpush1.msra.mxu1 %v2410_v46  ;;  %864 = vmatprep.mubr.f32.mxu1 %v2293_v0  ;;  %v1133_v28 = vsel %vm2724_vm8, %v1130_v25, %v1128_v26  ;;  %v1132_v30 = vsel %vm2724_vm8, %v1128_v26, %v1130_v25  ;;  %vm227_vm8 = vcmp.lt.s32.totalorder %v2455_v51, 51  ;;  %v2082_v46 = vsel %vm277_vm5, 1.0, %v2293_v0 }
 0x1ad   : > { %885 = vmatprep.subr.mxu1 %v879_v13  ;;  %vm229_vm7 = vmand %vm225_vm15, %vm227_vm8  ;;  %vm263_vm8 = vcmp.lt.s32.totalorder %v2455_v51, 90  ;;  %vm312_vm15 = vcmp.lt.s32.totalorder %v200_v40, 142  ;;  %2223 = vset.pattern.permute.xlu1 %v2307_v10 }
 0x1ae   : > { %v2078_v35 = vsel %vm229_vm7, 1.0, %v2293_v0  ;;  %vm265_vm13 = vmand %vm261_vm12, %vm263_vm8  ;;  %vm310_vm7 = vcmp.ge.s32.totalorder %v200_v40, 131  ;;  %vm322_vm12 = vcmp.ge.s32.totalorder %v200_v40, 144  ;;  %vm324_vm8 = vcmp.lt.s32.totalorder %v200_v40, 155 }
 0x1af   : > { %v235_v36 = vadd.f32 %v2078_v35, %v223_v34  ;;  %v2081_v42 = vsel %vm265_vm13, 1.0, %v2293_v0  ;;  %vm314_vm11 = vmand %vm310_vm7, %vm312_vm15  ;;  %vm297_vm13 = vcmp.ge.s32.totalorder %v2455_v51, 118  ;;  %v2114_v34 = vld [vmem:[%s2720_s1 + $0x68] sm:$0xff]  ;;  %vm2737_vm15 = vcmp.lt.s32.totalorder %v2455_v51, 115 }
 0x1b0   : > { %v2086_v52 = vsel %vm314_vm11, 1.0, %v2293_v0  ;;  %vm326_vm14 = vmand %vm322_vm12, %vm324_vm8  ;;  %v2084_v56 = vsel %vm297_vm13, 1.0, %v2293_v0 }
 0x1b1   : > { %v247_v38 = vadd.f32 %v2079_v37, %v235_v36  ;;  %v320_v57 = vadd.f32 %v2086_v52, %v2085_v50  ;;  %v2087_v61 = vsel %vm326_vm14, 1.0, %v2293_v0  ;;  %vm2736_vm7 = vmmov %vm2735_vm3 }
 0x1b2   : > { %vm2738_vm9 = vmmov %vm2737_vm15 }
 0x1b3   : > { %2097 = vmatmul.mubr.msk.f32.vlgmr.msra.gmra.mrb[0].mxu1 %vm340_vm0, %v2096_v14  ;;  %v259_v41 = vadd.f32 %v2080_v39, %v247_v38  ;;  %v332_v2 = vadd.f32 %v2087_v61, %v320_v57  ;;  %v2116_v39 = vld [vmem:[%s2720_s1 + $0x70] sm:$0xff] }
 0x1b4   : > { %886 = vmatpush1.msra.mxu1 %v878_v17  ;;  %949 = vmatprep.mubr.f32.mxu1 %v2293_v0  ;;  %v1215_v53 = vpop.permute.xlu0 %1214 }
 0x1b5   : > { %969 = vmatprep.subr.mxu1 %v963_v18  ;;  %v271_v43 = vadd.f32 %v2081_v42, %v259_v41 }
 0x1b7   : > { %v283_v47 = vadd.f32 %v2082_v46, %v271_v43  ;;  %v2118_v46 = vld [vmem:[%s2720_s1 + $0x78] sm:$0xff] }
 0x1b9   : > { %v295_v54 = vadd.f32 %v2083_v49, %v283_v47 }
 0x1bb   : > { %2099 = vmatmul.mubr.msk.f32.vlgmr.msra.gmra.mrb[0].mxu1 %vm340_vm0, %v2098_v19  ;;  %v307_v63 = vadd.f32 %v2084_v56, %v295_v54 }
 0x1bc   : > { %970 = vmatpush1.msra.mxu1 %v962_v22  ;;  %1033 = vmatprep.mubr.f32.mxu1 %v2293_v0  ;;  %v1221_v58 = vpop.permute.xlu1 %1220 }
 0x1bd   : > { %1054 = vmatprep.subr.mxu1 %v1048_v23  ;;  %v2106_v23 = vld [vmem:[%s2720_s1 + $0x48] sm:$0xff] }
 0x1c3   : > { %2101 = vmatmul.mubr.msk.f32.vlgmr.msra.gmra.mrb[0].mxu1 %vm340_vm0, %v2100_v24 }
 0x1c4   : > { %1055 = vmatpush1.msra.mxu1 %v1047_v27  ;;  %1118 = vmatprep.mubr.f32.mxu1 %v2293_v0 }
 0x1c5   : > { %1139 = vmatprep.subr.mxu1 %v1133_v28  ;;  %v2110_v28 = vld [vmem:[%s2720_s1 + $0x58] sm:$0xff] }
 0x1cb   : > { %2103 = vmatmul.mubr.msk.f32.vlgmr.msra.gmra.mrb[0].mxu1 %vm340_vm0, %v2102_v29 }
 0x1cc   : > { %1140 = vmatpush1.msra.mxu1 %v1132_v30  ;;  %1203 = vmatprep.mubr.f32.mxu1 %v2293_v0  ;;  %v2112_v30 = vld [vmem:[%s2720_s1 + $0x60] sm:$0xff] }
 0x1d3   : > { %2105 = vmatmul.mubr.msk.f32.vlgmr.msra.gmra.mrb[0].mxu1 %vm340_vm0, %v2104_v31 }
 0x2a6   : > { %v1205_v55 = vpop.f32.mrb[0].mxu1 }
 0x2a7   : > { %v1217_v59 = vmul.f32 %v1215_v53, %v1205_v55  ;;  %v1207_v60 = vpop.f32.mrb[1].mxu1  ;;  %v2122_v55 = vld [vmem:[%s2720_s1 + $0x88] sm:$0xff] }
 0x2a8   : > { %v1218_v62 = vmul.f32 %v1215_v53, %v1207_v60  ;;  %v2120_v53 = vld [vmem:[%s2720_s1 + $0x80] sm:$0xff] }
 0x2a9   : > { %v1223_v1 = vadd.f32 %v1221_v58, %v1217_v59 }
 0x2aa   : > { %v1224_v3 = vadd.f32 %v1221_v58, %v1218_v62 }
 0x2ab   : > { %v1225_v4 = vmax.f32 %v1223_v1, 0.0 }
 0x2ac   : > { %v1226_v7 = vmax.f32 %v1224_v3, 0.0 }
 0x2ad   : > { %v1227_v8 = vmul.f32 %v1225_v4, %v307_v63 }
 0x2ae   : > { %v1228_v9 = vmul.f32 %v1226_v7, %v332_v2 }
 0x2af   : > { %1237 = vrot.lane.b32.xlu1 %v1227_v8, %s2298_s11 }
 0x2b0   : > { %1239 = vrot.lane.b32.xlu0 %v1228_v9, %s2298_s11  ;;  %s188_s11 = sand.u32 1, %s2283_s16  }
 0x2b1   : > { %s1996_s30 = scalar_lea.sflag [#allocation3], %s188_s11 }
 0x2b3   : > { %1229 = vrot.lane.b32.xlu1 %v1227_v8, %s2297_s10 }
 0x2b4   : > { %1231 = vrot.lane.b32.xlu0 %v1228_v9, %s2297_s10 }
 0x2b7   : > { %1393 = vrot.lane.b32.xlu1 %v1227_v8, %s2299_s12 }
 0x2b8   : > { %1395 = vrot.lane.b32.xlu0 %v1228_v9, %s2299_s12  ;;  %s2073_s12 = sshll.u32 %s188_s11, 4 }
 0x2bb   : > { %1477 = vrot.lane.b32.xlu1 %v1227_v8, %s2300_s13 }
 0x2bc   : > { %1479 = vrot.lane.b32.xlu0 %v1228_v9, %s2300_s13  ;;  %s2130_s13 = sshll.u32 %s2356_s19, 8 }
 0x2bd   : > { %s2677_s29 = scalar_lea.hbm %s2723_s4, %s2130_s13 }
 0x2bf   : > { %1639 = vrot.lane.b32.xlu1 %v1227_v8, %s2301_s14 }
 0x2c0   : > { %1641 = vrot.lane.b32.xlu0 %v1228_v9, %s2301_s14  ;;  %s190_s14 = scalar_lea.vmem [#allocation2], %s2073_s12 }
 0x2c3   : > { %1723 = vrot.lane.b32.xlu1 %v1227_v8, %s2302_s20 }
 0x2c4   : > { %1725 = vrot.lane.b32.xlu0 %v1228_v9, %s2302_s20  ;;  %s2010_s20 = sshll.u32 %s190_s14, 4  ;;  %s2679_s20 = int_to_ptr.vmem [resolvable:$true] %s2010_s20 }
 0x2c5   : > { %s2229_s19 = scalar_lea.vmem %s2679_s20, 256  ;;  %p2236_p0 = scmp.lt.s32.totalorder %s2679_s20, %s2234_s6 }
 0x2c6   : > { %p2230_p11 = scmp.ne.s32.totalorder %s2679_s20, %s2229_s19  ;;  %p2237_p1 = scmp.lt.s32.totalorder %s2235_s7, %s2229_s19 }
 0x2c7   : > { %1807 = vrot.lane.b32.xlu1 %v1227_v8, %s2303_s22 }
 0x2c8   : > { %1809 = vrot.lane.b32.xlu0 %v1228_v9, %s2303_s22  ;;  %p2231_p12 = pnand %p2230_p11, %p2373_p5  ;;  %p2238_p2 = por %p2237_p1, %p2236_p0 }
 0x2ca   : > { %p2232_p13 = pneg %p2231_p12 }
 0x2cb   : > { %1891 = vrot.lane.b32.xlu1 %v1227_v8, %s2304_s23 }
 0x2cc   : > { %1893 = vrot.lane.b32.xlu0 %v1228_v9, %s2304_s23  ;;  %p2239_p3 = pnand %p2238_p2, %p2232_p13 }
 0x2cf   : > { %1976 = vperm.xlu1 %2223, %v2451_v48  }
 0x2d0   : > { %1982 = vperm.xlu0 %2224, %v2451_v48  }
 0x321   : > { %v1238_v12 = vpop.permute.xlu1 %1237 }
 0x322   : > { %v1240_v13 = vpop.permute.xlu0 %1239 }
 0x323   : > { %v1242_v14 = vsel %vm472_vm1, %v1240_v13, %v1238_v12  ;;  %v1241_v15 = vsel %vm472_vm1, %v1238_v12, %v1240_v13  ;;  %vm2731_vm1 = vcmp.lt.s32.totalorder %v2455_v51, 12 }
 0x324   : > { %1248 = vmatprep.subr.mxu0 %v1241_v15  ;;  %vm2732_vm4 = vmmov %vm2731_vm1 }
 0x325   : > { %1249 = vmatpush1.msra.mxu0 %v1242_v14  ;;  %v1230_v17 = vpop.permute.xlu1 %1229 }
 0x326   : > { %v1232_v18 = vpop.permute.xlu0 %1231  ;;  %2108 = vmatmul.mubr.msk.f32.vlgmr.msra.gmra.mrb[2].mxu0 %vm340_vm0, %v2107_v16 }
 0x327   : > { %v1234_v48 = vsel %vm464_vm2, %v1232_v18, %v1230_v17  ;;  %v1233_v19 = vsel %vm464_vm2, %v1230_v17, %v1232_v18  ;;  %1386 = vmatprep.mubr.f32.mxu0 %v2293_v0  ;;  %vm2733_vm2 = vcmp.lt.s32.totalorder %v2455_v51, 1 }
 0x328   : > { %1322 = vmatprep.subr.mxu0 %v1233_v19  ;;  %vm2734_vm5 = vmmov %vm2733_vm2 }
 0x329   : > { %1323 = vmatpush1.msra.mxu0 %v1234_v48  ;;  %v1394_v20 = vpop.permute.xlu1 %1393 }
 0x32a   : > { %v1396_v21 = vpop.permute.xlu0 %1395 }
 0x32b   : > { %v1397_v22 = vsel %vm2731_vm1, %v1394_v20, %v1396_v21  ;;  %v1398_v25 = vsel %vm2732_vm4, %v1396_v21, %v1394_v20 }
 0x32c   : > { %1404 = vmatprep.subr.mxu0 %v1397_v22 }
 0x32d   : > { %v1478_v24 = vpop.permute.xlu1 %1477 }
 0x32e   : > { %v1480_v26 = vpop.permute.xlu0 %1479  ;;  %2109 = vmatmul.mubr.msk.f32.vlgmr.msra.gmra.mrb[2].mxu0 %vm340_vm0, %v2106_v23 }
 0x32f   : > { %1405 = vmatpush1.msra.mxu0 %v1398_v25  ;;  %v1481_v27 = vsel %vm2733_vm2, %v1478_v24, %v1480_v26  ;;  %1468 = vmatprep.mubr.f32.mxu0 %v2293_v0  ;;  %v1482_v29 = vsel %vm2734_vm5, %v1480_v26, %v1478_v24 }
 0x330   : > { %1488 = vmatprep.subr.mxu0 %v1481_v27 }
 0x331   : > { %v1640_v31 = vpop.permute.xlu1 %1639 }
 0x332   : > { %v1642_v32 = vpop.permute.xlu0 %1641 }
 0x333   : > { %v1644_v33 = vsel %vm2735_vm3, %v1642_v32, %v1640_v31  ;;  %v1643_v37 = vsel %vm2736_vm7, %v1640_v31, %v1642_v32 }
 0x335   : > { %v1724_v35 = vpop.permute.xlu1 %1723 }
 0x336   : > { %2111 = vmatmul.mubr.msk.f32.vlgmr.msra.gmra.mrb[2].mxu0 %vm340_vm0, %v2110_v28  ;;  %v1726_v36 = vpop.permute.xlu0 %1725 }
 0x337   : > { %1489 = vmatpush1.msra.mxu0 %v1482_v29  ;;  %1552 = vmatprep.mubr.f32.mxu0 %v2293_v0  ;;  %v1728_v38 = vsel %vm287_vm6, %v1726_v36, %v1724_v35  ;;  %v1727_v42 = vsel %vm287_vm6, %v1724_v35, %v1726_v36  ;;  %vm2739_vm6 = vcmp.lt.s32.totalorder %v2455_v51, 114 }
 0x338   : > { %1566 = vmatprep.subr.mxu0 %v1228_v9  ;;  %vm2740_vm10 = vmmov %vm2739_vm6 }
 0x339   : > { %v1808_v40 = vpop.permute.xlu1 %1807 }
 0x33a   : > { %v1810_v41 = vpop.permute.xlu0 %1809 }
 0x33b   : > { %v1812_v43 = vsel %vm2737_vm15, %v1810_v41, %v1808_v40  ;;  %v1811_v50 = vsel %vm2738_vm9, %v1808_v40, %v1810_v41 }
 0x33d   : > { %v1892_v47 = vpop.permute.xlu1 %1891 }
 0x33e   : > { %2113 = vmatmul.mubr.msk.f32.vlgmr.msra.gmra.mrb[2].mxu0 %vm340_vm0, %v2112_v30  ;;  %v1894_v49 = vpop.permute.xlu0 %1893 }
 0x33f   : > { %1567 = vmatpush1.msra.mxu0 %v1227_v8  ;;  %1630 = vmatprep.mubr.f32.mxu0 %v2293_v0  ;;  %v1896_v52 = vsel %vm2739_vm6, %v1894_v49, %v1892_v47  ;;  %v1895_v54 = vsel %vm2740_vm10, %v1892_v47, %v1894_v49 }
 0x340   : > { %1650 = vmatprep.subr.mxu0 %v1644_v33 }
 0x346   : > { %2115 = vmatmul.mubr.msk.f32.vlgmr.msra.gmra.mrb[2].mxu0 %vm340_vm0, %v2114_v34 }
 0x347   : > { %1651 = vmatpush1.msra.mxu0 %v1643_v37  ;;  %1714 = vmatprep.mubr.f32.mxu0 %v2293_v0 }
 0x348   : > { %1734 = vmatprep.subr.mxu0 %v1728_v38 }
 0x34e   : > { %2117 = vmatmul.mubr.msk.f32.vlgmr.msra.gmra.mrb[2].mxu0 %vm340_vm0, %v2116_v39  ;;  %v1977_v56 = vpop.permute.xlu1 %1976 }
 0x34f   : > { %1735 = vmatpush1.msra.mxu0 %v1727_v42  ;;  %1798 = vmatprep.mubr.f32.mxu0 %v2293_v0  ;;  %v1983_v58 = vpop.permute.xlu0 %1982 }
 0x350   : > { %1818 = vmatprep.subr.mxu0 %v1812_v43 }
 0x356   : > { %2119 = vmatmul.mubr.msk.f32.vlgmr.msra.gmra.mrb[2].mxu0 %vm340_vm0, %v2118_v46 }
 0x357   : > { %1819 = vmatpush1.msra.mxu0 %v1811_v50  ;;  %1882 = vmatprep.mubr.f32.mxu0 %v2293_v0 }
 0x358   : > { %1902 = vmatprep.subr.mxu0 %v1896_v52 }
 0x35e   : > { %2121 = vmatmul.mubr.msk.f32.vlgmr.msra.gmra.mrb[2].mxu0 %vm340_vm0, %v2120_v53 }
 0x35f   : > { %1903 = vmatpush1.msra.mxu0 %v1895_v54  ;;  %1966 = vmatprep.mubr.f32.mxu0 %v2293_v0 }
 0x366   : > { %2123 = vmatmul.mubr.msk.f32.vlgmr.msra.gmra.mrb[2].mxu0 %vm340_vm0, %v2122_v55 }
 0x439   : > { %v1968_v57 = vpop.f32.mrb[2].mxu0 }
 0x43a   : > { %v1979_v59 = vmul.f32 %v1977_v56, %v1968_v57  ;;  %v1970_v60 = vpop.f32.mrb[3].mxu0 }
 0x43b   : > { %v1980_v51 = vmul.f32 %v1977_v56, %v1970_v60 }
 0x43c   : > { %v1985_v61 = vadd.f32 %v1983_v58, %v1979_v59 }
 0x43d   : > { %v1986_v62 = vadd.f32 %v1983_v58, %v1980_v51 }
 0x43e   : > { %v1987_v63 = vmul.f32 %v1985_v61, %v2404_v44 }
 0x43f   : > { %v1988_v0 = vmul.f32 %v1986_v62, %v2406_v45 }
 0x440   : > { %v1989_v1 = vadd.f32 %v1987_v63, %v2398_v6 }
 0x441   : > { %v1990_v2 = vadd.f32 %v1988_v0, %v2396_v5 }
 0x442   : > { %v1991_v3 = vmax.f32 %v1989_v1, 0.0 }
 0x443   : > { %v1992_v4 = vmax.f32 %v1990_v2, 0.0 }
 0x444   : > { %1993 = vst [vmem:[%s190_s14] sm:$0xff] %v1991_v3 }
 0x445   : > { %1994 = vst [vmem:[%s190_s14 + $0x8] sm:$0xff] %v1992_v4 }
 0x446   : > { %2242 = shalt.err (!%p2239_p3)
}
 0x447   : > { %s2243_s8 = scalar_lea.hbm %s2677_s29, 256  ;;  %s2247_s28 = scalar_lea.hbm %s2723_s4, 512 }
 0x448   : > { %p2244_p4 = scmp.ne.s32.totalorder %s2677_s29, %s2243_s8  ;;  %p2248_p9 = scmp.lt.u32.totalorder %s2677_s29, %s2723_s4 }
 0x449   : > { %p2249_p10 = scmp.lt.u32.totalorder %s2247_s28, %s2243_s8  ;;  %p2251_p12 = scmp.lt.u32.totalorder %s2243_s8, %s2677_s29 }
 0x44a   : > { %p2245_p7 = pnand %p2244_p4, %p2373_p5 }
 0x44b   : > { %p2250_p11 = por %p2249_p10, %p2248_p9 }
 0x44c   : > { %p2246_p8 = pneg %p2245_p7 }
 0x44d   : > { %p2252_p13 = por %p2251_p12, %p2250_p11 }
 0x44f   : > { %p2253_p0 = pnand %p2252_p13, %p2246_p8 }
 0x451   : > { %2256 = shalt.err (!%p2253_p0)
}
 0x452   : > { %2163 = dma.vmem_to_hbm [thread:$0]  (%p2373_p5), %s2679_s20, 256, %s2677_s29, %s1996_s30  }
 0x453 PF: > { %p2169_p1 = scmp.ge.s32.totalorder %s2291_s18, 2  ;;  %s2022_s12 = sand.u32 1, %s2279_s15  }
 0x454   : > { %s2023_s13 = scalar_lea.sflag [#allocation3], %s2022_s12 }
 0x455   : > { %p2166_p2 = pnand %p2169_p1, %p2377_p6 }
 0x457   : > { %2274 = dma.done.wait (!%p2166_p2), %s2023_s13, 256  }
 0x458   : > { %2276 = vsyncadd (!%p2166_p2), %s2023_s13, 4294967040  ;;  %p14_p3 = scmp.ge.s32.totalorder %s2360_s21, 4   ;;  %s2741_s15 = smov %s2283_s16 }
 0x459   : > { %s2742_s16 = smov %s2287_s17  ;;  %s2743_s17 = smov %s2371_s24 }
 0x45a   : > { %s2744_s18 = smov %s2360_s21  ;;  %16 = sbr.rel (!%p14_p3) target bundleno = 3 (0x3), region = 88 }
 0x461   :  { %2028 = vsyncpa [#allocation3], 1 }
 0x462   :  { %2030 = vsyncpa [#allocation3 + $0x1], 1 }

</bundles_post_ra>
